<compile_context>
chip_gen: v6e
topology: v6e:2x2x1
jax: 0.10.0
libtpu: 0.0.40
codegen_flags: <defaults>
</compile_context>

<pallas_src>
import functools
import math

import jax
import jax.numpy as jnp
from jax.experimental import pallas as pl
from jax.experimental.pallas import tpu as pltpu


def rnn_one_to_many_kernel(x_ref, wxh_ref, b1_ref, wf_ref, bf_ref,
                           wblk_ref, bblk_ref, outs_ref, hfin_ref, *,
                           seq_len):
    # Hoisted loads: every weight/bias is read from VMEM exactly once.
    wf = wf_ref[...]            # (H, H) fused recurrence weight
    bf = bf_ref[...]            # (1, H) fused recurrence bias

    # Step 1: h0 == 0, so whh(h0) contributes only bhh (folded into b1).
    h = jnp.tanh(jnp.dot(x_ref[...], wxh_ref[...],
                         preferred_element_type=jnp.float32) + b1_ref[...])
    hiddens = [h]

    # Serial recurrence: carry lives in vregs across the static unroll;
    # one small MXU matmul + one EUP tanh per step on the critical path.
    for _ in range(1, seq_len):
        h = jnp.tanh(jnp.dot(h, wf, preferred_element_type=jnp.float32) + bf)
        hiddens.append(h)

    # Output projection, off the critical path: one batched matmul against the
    # block-diagonal Wo; result is lane-dense (M, T*I) -> single wide store.
    h_all = jnp.concatenate(hiddens, axis=-1)             # (M, T*H)
    outs = jnp.dot(h_all, wblk_ref[...],
                   preferred_element_type=jnp.float32) + bblk_ref[...]
    outs_ref[...] = outs.astype(outs_ref.dtype)
    hfin_ref[...] = h.astype(hfin_ref.dtype)


def rnn_one_to_many(x, params, hidden_size, sequence_length):
    """Returns (stacked per-step outputs of shape (T, *lead, I), final hidden)."""
    wxh, bxh, whh, bhh, wo, bo = params          # linear weights already (in, out)
    in_size = x.shape[-1]
    batch = x.shape[0]

    # PyTorch broadcast of wxh(x): x.shape[:-1]+(H,) against whh(h0): (B, H).
    lead = jnp.broadcast_shapes(x.shape[:-1], (1, batch))
    M = math.prod(lead)
    x_flat = jnp.broadcast_to(x, lead + (in_size,)).reshape(M, in_size)

    T, H, I = sequence_length, hidden_size, in_size
    f32 = jnp.float32
    wxh32, whh32, wo32 = wxh.astype(f32), whh.astype(f32), wo.astype(f32)
    bxh32, bhh32, bo32 = bxh.astype(f32), bhh.astype(f32), bo.astype(f32)

    # Host-side parameter fusion (done once, outside the kernel).
    b1 = (bxh32 + bhh32).reshape(1, H)                       # step-1 bias
    w_fused = wo32 @ wxh32 + whh32                           # (H, H)
    b_fused = (bo32 @ wxh32 + bxh32 + bhh32).reshape(1, H)   # (1, H)
    w_blk = jnp.kron(jnp.eye(T, dtype=f32), wo32)            # (T*H, T*I) block-diag Wo
    b_blk = jnp.tile(bo32, T).reshape(1, T * I)              # (1, T*I)

    vmem = pl.BlockSpec(memory_space=pltpu.MemorySpace.VMEM)
    kernel = functools.partial(rnn_one_to_many_kernel, seq_len=T)

    # Total footprint is a few hundred KiB -> everything is VMEM-resident in a
    # single grid-less invocation on v5e/v6e/v7x.  A "parallel" grid over M is
    # only worthwhile once the batch is scaled far beyond this toy size.
    outs_cols, h_fin = pl.pallas_call(
        kernel,
        out_shape=(
            jax.ShapeDtypeStruct((M, T * I), x.dtype),
            jax.ShapeDtypeStruct((M, H), x.dtype),
        ),
        in_specs=[vmem] * 7,
        out_specs=(vmem, vmem),
    )(x_flat.astype(f32), wxh32, b1, w_fused, b_fused, w_blk, b_blk)

    # One reshape/transpose back to (T, *lead, I); no per-step host slicing.
    outputs = outs_cols.reshape((M, T, I)).transpose(1, 0, 2)
    outputs = outputs.reshape((T,) + tuple(lead) + (I,))
    h_final = h_fin.reshape(tuple(lead) + (H,))
    return outputs, h_final


def linear_params(key, in_features, out_features):
    """Deterministic nn.Linear-style init; weight returned as (in, out)."""
    kw, kb = jax.random.split(key)
    bound = 1.0 / math.sqrt(in_features)
    w = jax.random.uniform(kw, (out_features, in_features), jnp.float32,
                           -bound, bound)
    b = jax.random.uniform(kb, (out_features,), jnp.float32, -bound, bound)
    return w.T, b


if __name__ == "__main__":
    batch, input_size, hidden_size, seq_len = 2, 16, 32, 8

    key = jax.random.PRNGKey(0)
    kx, k1, k2, k3 = jax.random.split(key, 4)

    # x is 3-D (the module does `batch_size, _, _ = x.size()`); the middle dim
    # equals batch so the PyTorch broadcast of whh(h) against wxh(x) is valid.
    x = jax.random.normal(kx, (batch, batch, input_size), jnp.float32)

    wxh, bxh = linear_params(k1, input_size, hidden_size)
    whh, bhh = linear_params(k2, hidden_size, hidden_size)
    wo, bo = linear_params(k3, hidden_size, input_size)
    params = (wxh, bxh, whh, bhh, wo, bo)

    outputs, h = rnn_one_to_many(x, params, hidden_size, seq_len)
    jax.block_until_ready(outputs)
    jax.block_until_ready(h)

    # Pure-JAX reference of the PyTorch forward (un-fused) for a sanity check.
    def ref_forward(x):
        h0 = jnp.zeros((x.shape[0], hidden_size), jnp.float32)
        outs, cur, hh = [], x, h0
        for _ in range(seq_len):
            hidden = jnp.tanh(cur @ wxh + bxh + hh @ whh + bhh)
            cur = hidden @ wo + bo
            hh = hidden
            outs.append(cur)
        return jnp.stack(outs, axis=0), hh

    ref_outs, ref_h = ref_forward(x)
    assert outputs.shape == ref_outs.shape
    assert jnp.allclose(outputs, ref_outs, atol=1e-2, rtol=1e-2)
    assert h.shape == ref_h.shape
    assert jnp.allclose(h, ref_h, atol=1e-2, rtol=1e-2)

    print("KERNEL_OK")
</pallas_src>

<mosaic_0001>
module attributes {stable_mosaic.version = 11 : i64} {
  func.func @rnn_one_to_many_kernel(%arg0: memref<4x16xf32, #tpu.memory_space<vmem>>, %arg1: memref<16x32xf32, #tpu.memory_space<vmem>>, %arg2: memref<1x32xf32, #tpu.memory_space<vmem>>, %arg3: memref<32x32xf32, #tpu.memory_space<vmem>>, %arg4: memref<1x32xf32, #tpu.memory_space<vmem>>, %arg5: memref<256x128xf32, #tpu.memory_space<vmem>>, %arg6: memref<1x128xf32, #tpu.memory_space<vmem>>, %arg7: memref<4x128xf32, #tpu.memory_space<vmem>>, %arg8: memref<4x32xf32, #tpu.memory_space<vmem>>) attributes {dimension_semantics = [], scalar_prefetch = 0 : i64, scratch_operands = 0 : i64, tpu.core_type = #tpu.core_type<tc>} {
    %c0 = arith.constant 0 : index
    %c0_0 = arith.constant 0 : index
    %0 = vector.load %arg3[%c0, %c0_0] : memref<32x32xf32, #tpu.memory_space<vmem>>, vector<32x32xf32>
    %c0_1 = arith.constant 0 : index
    %c0_2 = arith.constant 0 : index
    %1 = vector.load %arg4[%c0_1, %c0_2] : memref<1x32xf32, #tpu.memory_space<vmem>>, vector<1x32xf32>
    %c0_3 = arith.constant 0 : index
    %c0_4 = arith.constant 0 : index
    %2 = vector.load %arg0[%c0_3, %c0_4] : memref<4x16xf32, #tpu.memory_space<vmem>>, vector<4x16xf32>
    %c0_5 = arith.constant 0 : index
    %c0_6 = arith.constant 0 : index
    %3 = vector.load %arg1[%c0_5, %c0_6] : memref<16x32xf32, #tpu.memory_space<vmem>>, vector<16x32xf32>
    %cst = arith.constant dense<0.000000e+00> : vector<4x32xf32>
    %4 = tpu.matmul %2, %3, %cst {dimension_numbers = #tpu.dot_dimension_numbers<[1], [0], [0], [1], [0, 0, 1, 1], [], []>} : vector<4x16xf32>, vector<16x32xf32>, vector<4x32xf32> -> vector<4x32xf32>
    %c0_7 = arith.constant 0 : index
    %c0_8 = arith.constant 0 : index
    %5 = vector.load %arg2[%c0_7, %c0_8] : memref<1x32xf32, #tpu.memory_space<vmem>>, vector<1x32xf32>
    %6 = vector.broadcast %5 : vector<1x32xf32> to vector<4x32xf32>
    %7 = arith.addf %4, %6 : vector<4x32xf32>
    %8 = math.tanh %7 : vector<4x32xf32>
    %cst_9 = arith.constant dense<0.000000e+00> : vector<4x32xf32>
    %9 = tpu.matmul %8, %0, %cst_9 {dimension_numbers = #tpu.dot_dimension_numbers<[1], [0], [0], [1], [0, 0, 1, 1], [], []>} : vector<4x32xf32>, vector<32x32xf32>, vector<4x32xf32> -> vector<4x32xf32>
    %10 = vector.broadcast %1 : vector<1x32xf32> to vector<4x32xf32>
    %11 = arith.addf %9, %10 : vector<4x32xf32>
    %12 = math.tanh %11 : vector<4x32xf32>
    %cst_10 = arith.constant dense<0.000000e+00> : vector<4x32xf32>
    %13 = tpu.matmul %12, %0, %cst_10 {dimension_numbers = #tpu.dot_dimension_numbers<[1], [0], [0], [1], [0, 0, 1, 1], [], []>} : vector<4x32xf32>, vector<32x32xf32>, vector<4x32xf32> -> vector<4x32xf32>
    %14 = vector.broadcast %1 : vector<1x32xf32> to vector<4x32xf32>
    %15 = arith.addf %13, %14 : vector<4x32xf32>
    %16 = math.tanh %15 : vector<4x32xf32>
    %cst_11 = arith.constant dense<0.000000e+00> : vector<4x32xf32>
    %17 = tpu.matmul %16, %0, %cst_11 {dimension_numbers = #tpu.dot_dimension_numbers<[1], [0], [0], [1], [0, 0, 1, 1], [], []>} : vector<4x32xf32>, vector<32x32xf32>, vector<4x32xf32> -> vector<4x32xf32>
    %18 = vector.broadcast %1 : vector<1x32xf32> to vector<4x32xf32>
    %19 = arith.addf %17, %18 : vector<4x32xf32>
    %20 = math.tanh %19 : vector<4x32xf32>
    %cst_12 = arith.constant dense<0.000000e+00> : vector<4x32xf32>
    %21 = tpu.matmul %20, %0, %cst_12 {dimension_numbers = #tpu.dot_dimension_numbers<[1], [0], [0], [1], [0, 0, 1, 1], [], []>} : vector<4x32xf32>, vector<32x32xf32>, vector<4x32xf32> -> vector<4x32xf32>
    %22 = vector.broadcast %1 : vector<1x32xf32> to vector<4x32xf32>
    %23 = arith.addf %21, %22 : vector<4x32xf32>
    %24 = math.tanh %23 : vector<4x32xf32>
    %cst_13 = arith.constant dense<0.000000e+00> : vector<4x32xf32>
    %25 = tpu.matmul %24, %0, %cst_13 {dimension_numbers = #tpu.dot_dimension_numbers<[1], [0], [0], [1], [0, 0, 1, 1], [], []>} : vector<4x32xf32>, vector<32x32xf32>, vector<4x32xf32> -> vector<4x32xf32>
    %26 = vector.broadcast %1 : vector<1x32xf32> to vector<4x32xf32>
    %27 = arith.addf %25, %26 : vector<4x32xf32>
    %28 = math.tanh %27 : vector<4x32xf32>
    %cst_14 = arith.constant dense<0.000000e+00> : vector<4x32xf32>
    %29 = tpu.matmul %28, %0, %cst_14 {dimension_numbers = #tpu.dot_dimension_numbers<[1], [0], [0], [1], [0, 0, 1, 1], [], []>} : vector<4x32xf32>, vector<32x32xf32>, vector<4x32xf32> -> vector<4x32xf32>
    %30 = vector.broadcast %1 : vector<1x32xf32> to vector<4x32xf32>
    %31 = arith.addf %29, %30 : vector<4x32xf32>
    %32 = math.tanh %31 : vector<4x32xf32>
    %cst_15 = arith.constant dense<0.000000e+00> : vector<4x32xf32>
    %33 = tpu.matmul %32, %0, %cst_15 {dimension_numbers = #tpu.dot_dimension_numbers<[1], [0], [0], [1], [0, 0, 1, 1], [], []>} : vector<4x32xf32>, vector<32x32xf32>, vector<4x32xf32> -> vector<4x32xf32>
    %34 = vector.broadcast %1 : vector<1x32xf32> to vector<4x32xf32>
    %35 = arith.addf %33, %34 : vector<4x32xf32>
    %36 = math.tanh %35 : vector<4x32xf32>
    %37 = tpu.concatenate %8, %12, %16, %20, %24, %28, %32, %36 in 1 : vector<4x32xf32>, vector<4x32xf32>, vector<4x32xf32>, vector<4x32xf32>, vector<4x32xf32>, vector<4x32xf32>, vector<4x32xf32>, vector<4x32xf32> -> vector<4x256xf32>
    %c0_16 = arith.constant 0 : index
    %c0_17 = arith.constant 0 : index
    %38 = vector.load %arg5[%c0_16, %c0_17] : memref<256x128xf32, #tpu.memory_space<vmem>>, vector<256x128xf32>
    %cst_18 = arith.constant dense<0.000000e+00> : vector<4x128xf32>
    %39 = tpu.matmul %37, %38, %cst_18 {dimension_numbers = #tpu.dot_dimension_numbers<[1], [0], [0], [1], [0, 0, 1, 1], [], []>} : vector<4x256xf32>, vector<256x128xf32>, vector<4x128xf32> -> vector<4x128xf32>
    %c0_19 = arith.constant 0 : index
    %c0_20 = arith.constant 0 : index
    %40 = vector.load %arg6[%c0_19, %c0_20] : memref<1x128xf32, #tpu.memory_space<vmem>>, vector<1x128xf32>
    %41 = vector.broadcast %40 : vector<1x128xf32> to vector<4x128xf32>
    %42 = arith.addf %39, %41 : vector<4x128xf32>
    %c0_21 = arith.constant 0 : index
    %c0_22 = arith.constant 0 : index
    %43 = vector.load %arg7[%c0_21, %c0_22] : memref<4x128xf32, #tpu.memory_space<vmem>>, vector<4x128xf32>
    tpu.vector_store %arg7[%c0_21, %c0_22], %42 {strides = array<i32>} : memref<4x128xf32, #tpu.memory_space<vmem>>, vector<4x128xf32>,
    %c0_23 = arith.constant 0 : index
    %c0_24 = arith.constant 0 : index
    %44 = vector.load %arg8[%c0_23, %c0_24] : memref<4x32xf32, #tpu.memory_space<vmem>>, vector<4x32xf32>
    tpu.vector_store %arg8[%c0_23, %c0_24], %36 {strides = array<i32>} : memref<4x32xf32, #tpu.memory_space<vmem>>, vector<4x32xf32>,
    return
  }
}

</mosaic_0001>

<bundles_post_ra>
// kernel: tpu_custom_call.1
= control target key start
LH: loop header
LB: loop body
LE: loop exit
PB: predicated region body
PF: predicated region fallthrough
CT: control target
= control target key end

     0   :  { %14 = vsyncpa [#allocation3], 0  ;;  %s1416_s0 = inlined_call_operand.hbm [shape: f32[4,16], index: 0, kind: input, shape index: {}]   ;;  %s1417_s1 = inlined_call_operand.hbm [shape: f32[16,32], index: 1, kind: input, shape index: {}]   ;;  %s1418_s2 = inlined_call_operand.vmem [shape: f32[1,32], index: 2, kind: input, shape index: {}]   ;;  %s1419_s3 = inlined_call_operand.hbm [shape: f32[32,32], index: 3, kind: input, shape index: {}]   ;;  %s1420_s4 = inlined_call_operand.vmem [shape: f32[1,32], index: 4, kind: input, shape index: {}]   ;;  %s1421_s5 = inlined_call_operand.hbm [shape: f32[256,128], index: 5, kind: input, shape index: {}]   ;;  %s1422_s6 = inlined_call_operand.vmem [shape: f32[1,128], index: 6, kind: input, shape index: {}]   ;;  %s1423_s7 = inlined_call_operand.hbm [shape: f32[4,128], index: 7, kind: output, shape index: {0}]   ;;  %s1424_s8 = inlined_call_operand.hbm [shape: f32[4,32], index: 8, kind: output, shape index: {1}]  }
   0x1   :  { %15 = vsyncpa [#allocation6], 0 }
   0x2   :  { %16 = vsyncpa [#allocation9], 0 }
   0x3   :  { %17 = vsyncpa [#allocation4], 0 }
   0x4   :  { %18 = vsyncpa [#allocation12], 0  ;;  %s1210_s27 = smov [#allocation5]  }
   0x5   :  { %s34_s28 = sshll.u32 %s1210_s27, 4  ;;  %s35_s28 = int_to_ptr.vmem [resolvable:$true] %s34_s28 }
   0x6   :  { %s1088_s29 = scalar_lea.vmem %s35_s28, 256  ;;  %p1093_p1 = scmp.lt.s32.totalorder %s35_s28, %s35_s28 }
   0x7   :  { %p1089_p0 = scmp.ne.s32.totalorder %s35_s28, %s1088_s29  ;;  %p1094_p2 = scmp.lt.s32.totalorder %s1088_s29, %s1088_s29 }
   0x9   :  { %p1095_p3 = por %p1094_p2, %p1093_p1 }
   0xb   :  { %p1096_p4 = pnand %p1095_p3, %p1089_p0 }
   0xd   :  { %1099 = shalt.err (!%p1096_p4)
}
   0xe   :  { %s1211_s30 = smov 128   ;;  %s1212_s9 = smov 8  }
   0xf   :  { %40 = dma.hbm_to_vmem [thread:$0]  %s1417_s1, 256, %s35_s28, [#allocation6], %s1211_s30, %s1211_s30, %s1212_s9  }
  0x10   :  { %s1213_s12 = smov [#allocation2]   ;;  %s1214_s14 = smov [#allocation7]  }
  0x11   :  { %s25_s13 = sshll.u32 %s1213_s12, 4  ;;  %s48_s15 = sshll.u32 %s1214_s14, 4  ;;  %s26_s13 = int_to_ptr.vmem [resolvable:$true] %s25_s13  ;;  %s49_s15 = int_to_ptr.vmem [resolvable:$true] %s48_s15 }
  0x12   :  { %s1108_s16 = scalar_lea.vmem %s26_s13, 64  ;;  %p1113_p6 = scmp.lt.s32.totalorder %s26_s13, %s26_s13 }
  0x13   :  { %p1109_p5 = scmp.ne.s32.totalorder %s26_s13, %s1108_s16  ;;  %p1114_p7 = scmp.lt.s32.totalorder %s1108_s16, %s1108_s16 }
  0x15   :  { %p1115_p8 = por %p1114_p7, %p1113_p6 }
  0x17   :  { %p1116_p9 = pnand %p1115_p8, %p1109_p5 }
  0x19   :  { %1119 = shalt.err (!%p1116_p9)
}
  0x1a   :  { %28 = dma.hbm_to_vmem [thread:$0]  %s1416_s0, 64, %s26_s13, [#allocation3]  }
  0x1b   :  { %s1128_s19 = scalar_lea.vmem %s49_s15, 512  ;;  %p1133_p11 = scmp.lt.s32.totalorder %s49_s15, %s49_s15 }
  0x1c   :  { %p1129_p10 = scmp.ne.s32.totalorder %s49_s15, %s1128_s19  ;;  %p1134_p12 = scmp.lt.s32.totalorder %s1128_s19, %s1128_s19 }
  0x1e   :  { %p1135_p13 = por %p1134_p12, %p1133_p11 }
  0x20   :  { %p1136_p0 = pnand %p1135_p13, %p1129_p10 }
  0x22   :  { %1139 = shalt.err (!%p1136_p0)
}
  0x23   :  { %54 = dma.hbm_to_vmem [thread:$0]  %s1419_s3, 512, %s49_s15, [#allocation6], %s1211_s30, %s1211_s30, %s1212_s9  }
  0x24   :  { %s1215_s21 = smov [#allocation8]  }
  0x25   :  { %s62_s22 = sshll.u32 %s1215_s21, 4  ;;  %s63_s22 = int_to_ptr.vmem [resolvable:$true] %s62_s22 }
  0x26   :  { %s1148_s23 = scalar_lea.vmem %s63_s22, 4096  ;;  %p1153_p2 = scmp.lt.s32.totalorder %s63_s22, %s63_s22 }
  0x27   :  { %p1149_p1 = scmp.ne.s32.totalorder %s63_s22, %s1148_s23  ;;  %p1154_p3 = scmp.lt.s32.totalorder %s1148_s23, %s1148_s23 }
  0x29   :  { %p1155_p4 = por %p1154_p3, %p1153_p2 }
  0x2b   :  { %p1156_p5 = pnand %p1155_p4, %p1149_p1 }
  0x2d   :  { %1159 = shalt.err (!%p1156_p5)
}
  0x2e   :  { %68 = dma.hbm_to_vmem [thread:$0]  %s1421_s5, 4096, %s63_s22, [#allocation9], %s1211_s30, %s1211_s30, %s1212_s9  }
  0x2f   :  { %1200 = dma.done.wait [#allocation3], 64  }
  0x30   :  { %1201 = vsyncadd [#allocation3], 4294967232 }
  0x31   :  { %1202 = dma.done.wait [#allocation6], 768  }
  0x32   :  { %1203 = vsyncadd [#allocation6], 4294966528 }
  0x33   :  { %1204 = dma.done.wait [#allocation9], 4096  }
  0x34   :  { %1205 = vsyncadd [#allocation9], 4294963200  ;;  %v1216_v0 = vmov 0.0   ;;  %vm1217_vm0 = vmmov 0   ;;  %v90_v1 = vld [vmem:[#allocation5 + $0x8] sm:$0xff]  ;;  %v89_v2 = vld [vmem:[#allocation5] sm:$0xff] }
  0x35   :  { %952 = vmatprep.subr.mxu1 %v1216_v0  ;;  %956 = vmatprep.mubr.msk.f32.mxu1 %vm1217_vm0, %v1216_v0  ;;  %v88_v3 = vld [vmem:[#allocation2] sm:$0xf]  ;;  %vm98_vm1 = vcmask 130048   ;;  %v1299_v4 = vld [vmem:[#allocation7 + $0x18] sm:$0xff]  ;;  %v1301_v5 = vld [vmem:[#allocation7 + $0x10] sm:$0xff]  ;;  %vm179_vm2 = vcmask 261120  }
  0x36   :  { %992 = vmatprep.subr.mxu0 %v1216_v0  ;;  %1000 = vmatprep.mubr.msk.f32.mxu0 %vm1217_vm0, %v1216_v0  ;;  %v1306_v6 = vld [vmem:[#allocation7 + $0x8] sm:$0xff]  ;;  %v1312_v7 = vld [vmem:[#allocation7] sm:$0xff]  ;;  %s1219_s26 = smov 64   ;;  %v756_v40 = vld [vmem:[#allocation8 + $0xf8] sm:$0xff]  ;;  %vm835_vm3 = vcmask 257024   ;;  %s1220_s27 = smov 96  }
  0x37   :  { %953 = vmatpush3.msra.mxu1 %v90_v1  ;;  %993 = vmatpush3.msra.mxu0 %v1299_v4  ;;  %v868_v8 = vld [vmem:[%s1418_s2] ss:$0 sm:$0xff]  ;;  %v740_v41 = vld [vmem:[#allocation8 + $0x78] sm:$0xff]  ;;  %v755_v42 = vld [vmem:[#allocation8 + $0xf0] sm:$0xff]  ;;  %vm718_vm4 = vcmask 523264   ;;  %vm720_vm5 = vcmask 785408  }
  0x38   :  { %954 = vmatprep.subr.mxu1 %v1216_v0  ;;  %994 = vmatprep.subr.mxu0 %v1216_v0  ;;  %v1343_v13 = vld [vmem:[%s1420_s4] ss:$0 sm:$0xff]  ;;  %s1218_s4 = smov 32   ;;  %v739_v43 = vld [vmem:[#allocation8 + $0x70] sm:$0xff]  ;;  %v753_v46 = vld [vmem:[#allocation8 + $0xe0] sm:$0xff]  ;;  %s1221_s28 = smov [#allocation11]  }
  0x39   :  { %955 = vmatpush3.msra.mxu1 %v89_v2  ;;  %995 = vmatpush3.msra.mxu0 %v1301_v5  ;;  %v754_v44 = vld [vmem:[#allocation8 + $0xe8] sm:$0xff]  ;;  %v737_v47 = vld [vmem:[#allocation8 + $0x60] sm:$0xff]  ;;  %v752_v48 = vld [vmem:[#allocation8 + $0xd8] sm:$0xff]  ;;  %s853_s29 = sshll.u32 %s1221_s28, 4  ;;  %s854_s29 = int_to_ptr.vmem [resolvable:$true] %s853_s29 }
  0x3a   :  { %957 = vmatmul.mubr.msk.f32.vlgmr.msra.gmra.mxu1 %vm98_vm1, %v88_v3  ;;  %959 = vmatprep.subr.mxu1 %v1216_v0  ;;  %v738_v45 = vld [vmem:[#allocation8 + $0x68] sm:$0xff]  ;;  %v736_v49 = vld [vmem:[#allocation8 + $0x58] sm:$0xff]  ;;  %v751_v50 = vld [vmem:[#allocation8 + $0xd0] sm:$0xff]  ;;  %s1160_s30 = scalar_lea.vmem %s854_s29, 64  ;;  %p1165_p7 = scmp.lt.s32.totalorder %s854_s29, %s854_s29 }
  0x3b   :  { %967 = vmatprep.mubr.msk.f32.mxu1 %vm1217_vm0, %v1216_v0  ;;  %960 = vmatpush3.msra.mxu1 %v1299_v4  ;;  %v735_v51 = vld [vmem:[#allocation8 + $0x50] sm:$0xff]  ;;  %v750_v52 = vld [vmem:[#allocation8 + $0xc8] sm:$0xff]  ;;  %v749_v54 = vld [vmem:[#allocation8 + $0xc0] sm:$0xff]  ;;  %p1161_p6 = scmp.ne.s32.totalorder %s854_s29, %s1160_s30  ;;  %p1166_p8 = scmp.lt.s32.totalorder %s1160_s30, %s1160_s30 }
  0x3c   :  { %961 = vmatprep.subr.mxu1 %v1216_v0  ;;  %996 = vmatprep.subr.mxu0 %v1216_v0  ;;  %v734_v53 = vld [vmem:[#allocation8 + $0x48] sm:$0xff]  ;;  %v733_v55 = vld [vmem:[#allocation8 + $0x40] sm:$0xff]  ;;  %v748_v56 = vld [vmem:[#allocation8 + $0xb8] sm:$0xff] }
  0x3d   :  { %962 = vmatpush3.msra.mxu1 %v1301_v5  ;;  %997 = vmatpush3.msra.mxu0 %v1306_v6  ;;  %v732_v57 = vld [vmem:[#allocation8 + $0x38] sm:$0xff]  ;;  %v747_v58 = vld [vmem:[#allocation8 + $0xb0] sm:$0xff]  ;;  %v746_v60 = vld [vmem:[#allocation8 + $0xa8] sm:$0xff]  ;;  %p1167_p9 = por %p1166_p8, %p1165_p7 }
  0x3e   :  { %963 = vmatprep.subr.mxu1 %v1216_v0  ;;  %998 = vmatprep.subr.mxu0 %v1216_v0  ;;  %v731_v59 = vld [vmem:[#allocation8 + $0x30] sm:$0xff]  ;;  %v730_v61 = vld [vmem:[#allocation8 + $0x28] sm:$0xff]  ;;  %v745_v62 = vld [vmem:[#allocation8 + $0xa0] sm:$0xff] }
  0x3f   :  { %964 = vmatpush3.msra.mxu1 %v1306_v6  ;;  %999 = vmatpush3.msra.mxu0 %v1312_v7  ;;  %v729_v63 = vld [vmem:[#allocation8 + $0x20] sm:$0xff]  ;;  %v728_v1 = vld [vmem:[#allocation8 + $0x18] sm:$0xff]  ;;  %v743_v2 = vld [vmem:[#allocation8 + $0x90] sm:$0xff]  ;;  %p1168_p10 = pnand %p1167_p9, %p1161_p6 }
  0x40   :  { %965 = vmatprep.subr.mxu1 %v1216_v0  ;;  %1014 = vmatprep.subr.mxu0 %v1216_v0  ;;  %v727_v3 = vld [vmem:[#allocation8 + $0x10] sm:$0xff] }
  0x41   :  { %966 = vmatpush3.msra.mxu1 %v1312_v7 }
  0x42   :  { %970 = vmatprep.subr.mxu1 %v1216_v0 }
  0xfa   :  { %v168_v9 = vpop.f32.mrf.mxu1 }
  0xfb   :  { %v169_v10 = vadd.f32 %v868_v8, %v168_v9  ;;  %v726_v8 = vld [vmem:[#allocation8 + $0x8] sm:$0xff]  ;;  %v741_v9 = vld [vmem:[#allocation8 + $0x80] sm:$0xff] }
  0xfc   :  { %v958_v11 = vpop.f32.mrf.mxu1 }
  0xfd   :  { %1064 = vtanh.f32 %v169_v10  ;;  %v725_v10 = vld [vmem:[#allocation8] sm:$0xff] }
 0x10a   :  { %v1326_v12 = vpop.eup %1064 }
 0x10b   :  { %968 = vmatmul.mubr.msk.f32.vlgmr.msra.gmra.mxu1 %vm179_vm2, %v1326_v12 }
 0x10c   :  { %971 = vmatpush3.msra.mxu1 %v1299_v4  ;;  %978 = vmatprep.mubr.msk.f32.mxu1 %vm1217_vm0, %v1216_v0 }
 0x10d   :  { %972 = vmatprep.subr.mxu1 %v1216_v0 }
 0x10e   :  { %973 = vmatpush3.msra.mxu1 %v1301_v5 }
 0x10f   :  { %974 = vmatprep.subr.mxu1 %v1216_v0 }
 0x110   :  { %975 = vmatpush3.msra.mxu1 %v1306_v6 }
 0x111   :  { %976 = vmatprep.subr.mxu1 %v1216_v0 }
 0x112   :  { %977 = vmatpush3.msra.mxu1 %v1312_v7 }
 0x113   :  { %981 = vmatprep.subr.mxu1 %v1216_v0 }
 0x1cb   :  { %v249_v14 = vpop.f32.mrf.mxu1 }
 0x1cc   :  { %v250_v15 = vadd.f32 %v1343_v13, %v249_v14 }
 0x1cd   :  { %v969_v16 = vpop.f32.mrf.mxu1 }
 0x1ce   :  { %1066 = vtanh.f32 %v250_v15 }
 0x1db   :  { %v1067_v17 = vpop.eup %1066 }
 0x1dc   :  { %979 = vmatmul.mubr.msk.f32.vlgmr.msra.gmra.mxu1 %vm179_vm2, %v1067_v17 }
 0x1dd   :  { %982 = vmatpush3.msra.mxu1 %v1299_v4  ;;  %989 = vmatprep.mubr.msk.f32.mxu1 %vm1217_vm0, %v1216_v0 }
 0x1de   :  { %983 = vmatprep.subr.mxu1 %v1216_v0 }
 0x1df   :  { %984 = vmatpush3.msra.mxu1 %v1301_v5 }
 0x1e0   :  { %985 = vmatprep.subr.mxu1 %v1216_v0 }
 0x1e1   :  { %986 = vmatpush3.msra.mxu1 %v1306_v6 }
 0x1e2   :  { %987 = vmatprep.subr.mxu1 %v1216_v0 }
 0x1e3   :  { %988 = vmatpush3.msra.mxu1 %v1312_v7 }
 0x1e4   :  { %1003 = vmatprep.subr.mxu1 %v1216_v0 }
 0x29c   :  { %v323_v18 = vpop.f32.mrf.mxu1 }
 0x29d   :  { %v324_v19 = vadd.f32 %v1343_v13, %v323_v18 }
 0x29e   :  { %v980_v20 = vpop.f32.mrf.mxu1 }
 0x29f   :  { %1068 = vtanh.f32 %v324_v19 }
 0x2ac   :  { %v1069_v21 = vpop.eup %1068 }
 0x2ad   :  { %990 = vmatmul.mubr.msk.f32.vlgmr.msra.gmra.mxu1 %vm179_vm2, %v1069_v21 }
 0x2ae   :  { %1004 = vmatpush3.msra.mxu1 %v1299_v4  ;;  %1011 = vmatprep.mubr.msk.f32.mxu1 %vm1217_vm0, %v1216_v0 }
 0x2af   :  { %1005 = vmatprep.subr.mxu1 %v1216_v0 }
 0x2b0   :  { %1006 = vmatpush3.msra.mxu1 %v1301_v5 }
 0x2b1   :  { %1007 = vmatprep.subr.mxu1 %v1216_v0 }
 0x2b2   :  { %1008 = vmatpush3.msra.mxu1 %v1306_v6 }
 0x2b3   :  { %1009 = vmatprep.subr.mxu1 %v1216_v0 }
 0x2b4   :  { %1010 = vmatpush3.msra.mxu1 %v1312_v7 }
 0x2b5   :  { %1025 = vmatprep.subr.mxu1 %v1216_v0 }
 0x36d   :  { %v397_v22 = vpop.f32.mrf.mxu1 }
 0x36e   :  { %v398_v23 = vadd.f32 %v1343_v13, %v397_v22 }
 0x36f   :  { %v991_v24 = vpop.f32.mrf.mxu1 }
 0x370   :  { %1070 = vtanh.f32 %v398_v23 }
 0x37d   :  { %v1370_v25 = vpop.eup %1070 }
 0x37e   :  { %1001 = vmatmul.mubr.msk.f32.vlgmr.msra.gmra.mxu0 %vm179_vm2, %v1370_v25 }
 0x37f   :  { %1015 = vmatpush3.msra.mxu0 %v1299_v4  ;;  %1022 = vmatprep.mubr.msk.f32.mxu0 %vm1217_vm0, %v1216_v0 }
 0x380   :  { %1016 = vmatprep.subr.mxu0 %v1216_v0 }
 0x381   :  { %1017 = vmatpush3.msra.mxu0 %v1301_v5 }
 0x382   :  { %1018 = vmatprep.subr.mxu0 %v1216_v0 }
 0x383   :  { %1019 = vmatpush3.msra.mxu0 %v1306_v6 }
 0x384   :  { %1020 = vmatprep.subr.mxu0 %v1216_v0 }
 0x385   :  { %1021 = vmatpush3.msra.mxu0 %v1312_v7 }
 0x386   :  { %917 = vmatprep.subr.mxu0 %v756_v40 }
 0x43e   :  { %v471_v26 = vpop.f32.mrf.mxu0 }
 0x43f   :  { %v472_v27 = vadd.f32 %v1343_v13, %v471_v26 }
 0x440   :  { %v1002_v28 = vpop.f32.mrf.mxu0 }
 0x441   :  { %1072 = vtanh.f32 %v472_v27 }
 0x44e   :  { %v1384_v29 = vpop.eup %1072 }
 0x44f   :  { %1012 = vmatmul.mubr.msk.f32.vlgmr.msra.gmra.mxu1 %vm179_vm2, %v1384_v29 }
 0x450   :  { %1026 = vmatpush3.msra.mxu1 %v1299_v4  ;;  %1033 = vmatprep.mubr.msk.f32.mxu1 %vm1217_vm0, %v1216_v0 }
 0x451   :  { %1027 = vmatprep.subr.mxu1 %v1216_v0 }
 0x452   :  { %1028 = vmatpush3.msra.mxu1 %v1301_v5 }
 0x453   :  { %1029 = vmatprep.subr.mxu1 %v1216_v0 }
 0x454   :  { %1030 = vmatpush3.msra.mxu1 %v1306_v6 }
 0x455   :  { %1031 = vmatprep.subr.mxu1 %v1216_v0  ;;  %v744_v0 = vld [vmem:[#allocation8 + $0x98] sm:$0xff] }
 0x456   :  { %1032 = vmatpush3.msra.mxu1 %v1312_v7  ;;  %v742_v7 = vld [vmem:[#allocation8 + $0x88] sm:$0xff] }
 0x50f   :  { %v545_v30 = vpop.f32.mrf.mxu1 }
 0x510   :  { %v546_v31 = vadd.f32 %v1343_v13, %v545_v30 }
 0x511   :  { %v1013_v32 = vpop.f32.mrf.mxu1 }
 0x512   :  { %1074 = vtanh.f32 %v546_v31 }
 0x51f   :  { %v1075_v33 = vpop.eup %1074 }
 0x520   :  { %1023 = vmatmul.mubr.msk.f32.vlgmr.msra.gmra.mxu0 %vm179_vm2, %v1075_v33  ;;  %v1049_v34 = vpack.i.bf16 %v1067_v17, %v1075_v33 }
 0x521   :  { %918 = vmatpush3.msra.mxu0 %v740_v41 }
 0x522   :  { %1050 = vrot.lane.b32.xlu0 %v1049_v34, %s1218_s4  ;;  %919 = vmatprep.subr.mxu0 %v755_v42 }
 0x523   :  { %920 = vmatpush3.msra.mxu0 %v739_v43 }
 0x524   :  { %921 = vmatprep.subr.mxu0 %v754_v44 }
 0x525   :  { %922 = vmatpush3.msra.mxu0 %v738_v45 }
 0x526   :  { %923 = vmatprep.subr.mxu0 %v753_v46 }
 0x527   :  { %924 = vmatpush3.msra.mxu0 %v737_v47 }
 0x528   :  { %925 = vmatprep.subr.mxu0 %v752_v48 }
 0x529   :  { %926 = vmatpush3.msra.mxu0 %v736_v49 }
 0x52a   :  { %927 = vmatprep.subr.mxu0 %v751_v50 }
 0x52b   :  { %928 = vmatpush3.msra.mxu0 %v735_v51 }
 0x52c   :  { %929 = vmatprep.subr.mxu0 %v750_v52 }
 0x52d   :  { %930 = vmatpush3.msra.mxu0 %v734_v53 }
 0x52e   :  { %931 = vmatprep.subr.mxu0 %v749_v54 }
 0x52f   :  { %932 = vmatpush3.msra.mxu0 %v733_v55 }
 0x530   :  { %933 = vmatprep.subr.mxu0 %v748_v56 }
 0x531   :  { %934 = vmatpush3.msra.mxu0 %v732_v57 }
 0x532   :  { %935 = vmatprep.subr.mxu0 %v747_v58 }
 0x533   :  { %936 = vmatpush3.msra.mxu0 %v731_v59 }
 0x534   :  { %937 = vmatprep.subr.mxu0 %v746_v60 }
 0x535   :  { %938 = vmatpush3.msra.mxu0 %v730_v61 }
 0x536   :  { %939 = vmatprep.subr.mxu0 %v745_v62 }
 0x537   :  { %940 = vmatpush3.msra.mxu0 %v729_v63 }
 0x538   :  { %941 = vmatprep.subr.mxu0 %v744_v0 }
 0x539   :  { %942 = vmatpush3.msra.mxu0 %v728_v1 }
 0x53a   :  { %943 = vmatprep.subr.mxu0 %v743_v2 }
 0x53b   :  { %944 = vmatpush3.msra.mxu0 %v727_v3 }
 0x53c   :  { %945 = vmatprep.subr.mxu0 %v742_v7 }
 0x53d   :  { %946 = vmatpush3.msra.mxu0 %v726_v8 }
 0x53e   :  { %947 = vmatprep.subr.mxu0 %v741_v9 }
 0x53f   :  { %948 = vmatpush3.msra.mxu0 %v725_v10 }
 0x594   :  { %v1051_v15 = vpop.permute.xlu0 %1050 }
 0x595   :  { %v1052_v17 = vunpack.i.l.bf16 %v1051_v15 }
 0x597   :  { %v722_v24 = vsel %vm179_vm2, %v1384_v29, %v1052_v17 }
 0x5e0   :  { %v619_v35 = vpop.f32.mrf.mxu0 }
 0x5e1   :  { %v620_v36 = vadd.f32 %v1343_v13, %v619_v35 }
 0x5e2   :  { %v1024_v37 = vpop.f32.mrf.mxu0 }
 0x5e3   :  { %1076 = vtanh.f32 %v620_v36 }
 0x5f0   :  { %v1077_v38 = vpop.eup %1076 }
 0x5f1   :  { %1034 = vmatmul.mubr.msk.f32.vlgmr.msra.gmra.mxu1 %vm179_vm2, %v1077_v38  ;;  %v1054_v39 = vpack.i.bf16 %v1069_v21, %v1077_v38 }
 0x5f3   :  { %1055 = vrot.lane.b32.xlu0 %v1054_v39, %s1219_s26 }
 0x665   :  { %v1056_v16 = vpop.permute.xlu0 %1055 }
 0x666   :  { %v1058_v18 = vunpack.i.h.bf16 %v1056_v16  ;;  %v1057_v19 = vunpack.i.l.bf16 %v1056_v16 }
 0x668   :  { %v723_v26 = vsel %vm718_vm4, %v722_v24, %v1057_v19 }
 0x6b1   :  { %v693_v4 = vpop.f32.mrf.mxu1 }
 0x6b2   :  { %v694_v5 = vadd.f32 %v1343_v13, %v693_v4  ;;  %v1053_v13 = vunpack.i.h.bf16 %v1051_v15 }
 0x6b3   :  { %v1035_v6 = vpop.f32.mrf.mxu1 }
 0x6b4   :  { %1078 = vtanh.f32 %v694_v5  ;;  %v717_v21 = vsel %vm179_vm2, %v1326_v12, %v1053_v13 }
 0x6c1   :  { %v1079_v11 = vpop.eup %1078 }
 0x6c2   :  { %v1059_v14 = vpack.i.bf16 %v1370_v25, %v1079_v11  ;;  %836 = vst.msk [vmem:[#allocation11] sm:$0xf] %vm835_vm3, %v1079_v11  ;;  %v719_v25 = vsel %vm718_vm4, %v717_v21, %v1058_v18 }
 0x6c4   :  { %1060 = vrot.lane.b32.xlu1 %v1059_v14, %s1220_s27 }
 0x736   :  { %v1061_v20 = vpop.permute.xlu1 %1060 }
 0x737   :  { %v1063_v22 = vunpack.i.h.bf16 %v1061_v20  ;;  %v1062_v23 = vunpack.i.l.bf16 %v1061_v20 }
 0x739   :  { %v724_v27 = vsel %vm720_vm5, %v723_v26, %v1062_v23  ;;  %v721_v28 = vsel %vm720_vm5, %v719_v25, %v1063_v22 }
 0x73a   :  { %828 = vmatprep.mubr.f32.mxu0 %v724_v27 }
 0x73b   :  { %829 = vmatmul.mubr.f32.vlgmr.msra.gmra.mxu0 %v721_v28 }
 0x73c   :  { %1171 = shalt.err (!%p1168_p10)
}
 0x73d   :  { %856 = dma.vmem_to_hbm [thread:$0]  %s854_s29, 64, %s1424_s8, [#allocation12]   ;;  %v878_v29 = vld [vmem:[%s1422_s6] ss:$0 sm:$0xff] }
 0x73e   :  { %s1222_s13 = smov [#allocation10]  }
 0x73f   :  { %s843_s14 = sshll.u32 %s1222_s13, 4  ;;  %s844_s14 = int_to_ptr.vmem [resolvable:$true] %s843_s14 }
 0x740   :  { %s1180_s15 = scalar_lea.vmem %s844_s14, 64  ;;  %p1185_p12 = scmp.lt.s32.totalorder %s844_s14, %s844_s14 }
 0x741   :  { %p1181_p11 = scmp.ne.s32.totalorder %s844_s14, %s1180_s15  ;;  %p1186_p13 = scmp.lt.s32.totalorder %s1180_s15, %s1180_s15 }
 0x743   :  { %p1187_p0 = por %p1186_p13, %p1185_p12 }
 0x745   :  { %p1188_p1 = pnand %p1187_p0, %p1181_p11 }
 0x7fb   :  { %v949_v12 = vpop.f32.mrf.mxu0 }
 0x7fd   :  { %v950_v30 = vpop.f32.mrf.mxu0 }
 0x7fe   :  { %v951_v31 = vadd.f32 %v950_v30, %v949_v12 }
 0x800   :  { %v831_v32 = vadd.f32 %v951_v31, %v878_v29 }
 0x802   :  { %834 = vst [vmem:[#allocation10] sm:$0xf] %v831_v32 }
 0x803   :  { %1191 = shalt.err (!%p1188_p1)
}
 0x804   :  { %846 = dma.vmem_to_hbm [thread:$0]  %s844_s14, 64, %s1423_s7, [#allocation4]  }
 0x805   :  { %1206 = dma.done.wait [#allocation4], 64  }
 0x806   :  { %1207 = vsyncadd [#allocation4], 4294967232 }
 0x807   :  { %1208 = dma.done.wait [#allocation12], 64  }
 0x808   :  { %1209 = vsyncadd [#allocation12], 4294967232 }
 0x809   :  { %863 = vsyncpa [#allocation3], 1 }
 0x80a   :  { %864 = vsyncpa [#allocation6], 1 }
 0x80b   :  { %865 = vsyncpa [#allocation9], 1 }
 0x80c   :  { %866 = vsyncpa [#allocation4], 1 }
 0x80d   :  { %867 = vsyncpa [#allocation12], 1 }

</bundles_post_ra>
